<compile_context>
chip_gen: v6e
topology: v6e:2x2x1
jax: 0.10.0
libtpu: 0.0.40
codegen_flags: <defaults>
</compile_context>

<pallas_src>
import jax
import jax.numpy as jnp
from jax import lax
from jax.experimental import pallas as pl
from jax.experimental.pallas import tpu as pltpu


def _round_up(x: int, m: int) -> int:
    return ((x + m - 1) // m) * m


def _vmem_capacity_bytes() -> int:
    try:
        cap = int(pltpu.get_tpu_info().vmem_capacity_bytes)
        if cap > 0:
            return cap
    except Exception:
        pass
    return 64 << 20  # conservative fallback (v7x per-TC size)


def _mlp_kernel(x_ref, wg_ref, wu_ref, wd_ref, o_ref, acc_ref):
    # x_ref:  (tm, H)   resident across the i axis (block index constant in i)
    # wg_ref: (ti, H)   gate_proj slab, PyTorch (out, in) layout
    # wu_ref: (ti, H)   up_proj slab
    # wd_ref: (H, ti)   down_proj slab
    # o_ref:  (tm, H)   output rows, written only on the last i step
    # acc_ref:(tm, H)   f32 VMEM accumulator scratch
    i = pl.program_id(1)

    @pl.when(i == 0)
    def _():
        acc_ref[...] = jnp.zeros_like(acc_ref)

    x = x_ref[...]
    # x (tm,H) . W (ti,H)^T -> (tm, ti): contract the hidden axis of both.
    dn = (((1,), (1,)), ((), ()))
    gate = lax.dot_general(x, wg_ref[...], dn,
                           preferred_element_type=jnp.float32)
    up = lax.dot_general(x, wu_ref[...], dn,
                         preferred_element_type=jnp.float32)
    # SiLU(gate) * up in f32 (EUP sigmoid + VPU muls).
    h = (gate * jax.nn.sigmoid(gate)) * up
    # Cast h to the *weight* dtype so the down-proj matmul runs at the MXU's
    # fast (bf16) rate even when callers pass f32 activations.
    acc_ref[...] += lax.dot_general(h.astype(wd_ref.dtype), wd_ref[...], dn,
                                    preferred_element_type=jnp.float32)

    @pl.when(i == pl.num_programs(1) - 1)
    def _():
        o_ref[...] = acc_ref[...].astype(o_ref.dtype)


def mlp_pallas(x, w_gate, w_up, w_down, *, tile_m=None, tile_i=None,
               vmem_limit_bytes=None):
    """SwiGLU MLP forward.

    x:       (..., H)   activations (f32 or bf16)
    w_gate:  (I, H)     PyTorch nn.Linear layout (out_features, in_features)
    w_up:    (I, H)
    w_down:  (H, I)
    returns: same shape as x.
    """
    orig_shape = x.shape
    H = orig_shape[-1]
    xm = x.reshape(-1, H)
    M = xm.shape[0]
    I, Hw = w_gate.shape
    assert Hw == H and w_up.shape == (I, H) and w_down.shape == (H, I)

    x_sz = jnp.dtype(xm.dtype).itemsize
    w_sz = jnp.dtype(w_gate.dtype).itemsize
    out_sz = x_sz

    # --- Generation-aware defaults -------------------------------------------
    vmem_cap = _vmem_capacity_bytes()
    small_vmem = vmem_cap <= (80 << 20)     # v7x-class: 64 MiB/TC, 2 TCs/chip
    pref_tile_m = 512 if small_vmem else 768   # keep AI above the compute-bound knee
    pref_tile_i = 512 if small_vmem else 1024  # weight HBM traffic independent of tile_i
    sublane = 16 if x_sz == 2 else 8           # bf16 packs 16 rows/vreg

    auto_m = tile_m is None
    if auto_m:
        if M >= pref_tile_m:
            tile_m = pref_tile_m
        elif M >= 128:
            tile_m = _round_up(M, 128)
        else:
            tile_m = _round_up(M, sublane)
        # 2-TensorCore chips: give the "parallel" m axis >= 2 tiles when M allows
        # so both cores get work.
        if small_vmem and M > 256:
            tile_m = min(tile_m, _round_up((M + 1) // 2, 128))
        # TODO(synk): for v7x decode (M <= 256) split the i axis across the two
        # TensorCores with per-core partial accumulators and a final add.
    tile_m = int(tile_m)

    auto_i = tile_i is None
    if auto_i:
        tile_i = min(pref_tile_i, _round_up(I, 128))
    tile_i = int(tile_i)
    assert tile_i % 128 == 0, "tile_i must be lane-aligned (multiple of 128)"

    # --- VMEM working-set fit -------------------------------------------------
    def need(tm, ti, wbufs):
        return (2 * tm * H * x_sz            # x slab (double-buffered)
                + wbufs * 2 * ti * H * w_sz  # gate + up slabs
                + wbufs * H * ti * w_sz      # down slab
                + 2 * tm * H * out_sz        # output slab
                + tm * H * 4)                # f32 accumulator scratch

    budget = vmem_cap - (8 << 20)  # headroom for Mosaic internal scratch
    while auto_i and tile_i > 128 and need(tile_m, tile_i, 2) > budget:
        tile_i = max(128, tile_i // 2)
    while auto_m and tile_m > sublane and need(tile_m, tile_i, 2) > budget:
        tile_m = max(sublane, _round_up(tile_m // 2, sublane))

    m_pad = _round_up(M, tile_m)
    i_pad = _round_up(I, tile_i)
    grid_m = m_pad // tile_m
    grid_i = i_pad // tile_i

    # --- Pad ragged shapes (no asserts) --------------------------------------
    # Zero rows -> zero outputs (sliced off).  Zero intermediate columns ->
    # SiLU(0) * 0 == 0 -> contribute nothing to the down projection.
    if m_pad != M:
        xm = jnp.pad(xm, ((0, m_pad - M), (0, 0)))
    wg, wu, wd = w_gate, w_up, w_down
    if i_pad != I:
        wg = jnp.pad(wg, ((0, i_pad - I), (0, 0)))
        wu = jnp.pad(wu, ((0, i_pad - I), (0, 0)))
        wd = jnp.pad(wd, ((0, 0), (0, i_pad - I)))

    # --- Decode-shaped calls: deeper weight pipelining if it fits ------------
    weight_bufs = 2
    if grid_m == 1 and grid_i >= 4 and need(tile_m, tile_i, 3) <= budget:
        weight_bufs = 3

    def _wspec(shape, idx):
        if weight_bufs > 2:
            try:
                return pl.BlockSpec(shape, idx,
                                    pipeline_mode=pl.Buffered(weight_bufs))
            except TypeError:
                pass
        return pl.BlockSpec(shape, idx)

    if vmem_limit_bytes is None:
        vmem_limit_bytes = int(min(
            budget,
            max(32 << 20, need(tile_m, tile_i, weight_bufs) + (8 << 20))))

    cost = pl.CostEstimate(
        flops=6 * m_pad * H * i_pad,
        transcendentals=m_pad * i_pad,
        # Weights are re-streamed once per m tile.
        bytes_accessed=2 * m_pad * H * x_sz + grid_m * 3 * i_pad * H * w_sz,
    )

    out = pl.pallas_call(
        _mlp_kernel,
        out_shape=jax.ShapeDtypeStruct((m_pad, H), x.dtype),
        grid_spec=pltpu.PrefetchScalarGridSpec(
            num_scalar_prefetch=0,
            grid=(grid_m, grid_i),
            in_specs=[
                pl.BlockSpec((tile_m, H), lambda m, i: (m, 0)),   # x rows
                _wspec((tile_i, H), lambda m, i: (i, 0)),         # gate slab
                _wspec((tile_i, H), lambda m, i: (i, 0)),         # up slab
                _wspec((H, tile_i), lambda m, i: (0, i)),         # down slab
            ],
            out_specs=pl.BlockSpec((tile_m, H), lambda m, i: (m, 0)),
            scratch_shapes=[pltpu.VMEM((tile_m, H), jnp.float32)],
        ),
        compiler_params=pltpu.CompilerParams(
            dimension_semantics=("parallel", "arbitrary"),
            vmem_limit_bytes=vmem_limit_bytes,
        ),
        cost_estimate=cost,
    )(xm, wg, wu, wd)

    return out[:M].reshape(orig_shape)


def mlp_reference(x, w_gate, w_up, w_down):
    gate = jnp.einsum("...h,ih->...i", x, w_gate)
    up = jnp.einsum("...h,ih->...i", x, w_up)
    h = jax.nn.silu(gate) * up
    return jnp.einsum("...i,hi->...h", h, w_down)


if __name__ == "__main__":
    key = jax.random.PRNGKey(0)
    keys = jax.random.split(key, 12)

    # --- Test 1: module-default toy shapes (auto tiles, single grid step). ---
    B, S, H, I = 2, 8, 32, 64
    x = jax.random.normal(keys[0], (B, S, H), dtype=jnp.float32)
    w_gate = jax.random.normal(keys[1], (I, H), dtype=jnp.float32) * (1.0 / H ** 0.5)
    w_up = jax.random.normal(keys[2], (I, H), dtype=jnp.float32) * (1.0 / H ** 0.5)
    w_down = jax.random.normal(keys[3], (H, I), dtype=jnp.float32) * (1.0 / I ** 0.5)

    out = jax.block_until_ready(mlp_pallas(x, w_gate, w_up, w_down))
    ref = mlp_reference(x, w_gate, w_up, w_down)
    assert out.shape == (B, S, H)
    assert jnp.allclose(out, ref, atol=1e-4, rtol=1e-4), "test-1 mismatch"

    # --- Test 2: ragged M and ragged I (accumulator + zero-padded tail). ----
    B2, S2, H2, I2 = 2, 9, 32, 192          # M=18 -> padded to 32; I=192 -> 256
    x2 = jax.random.normal(keys[4], (B2, S2, H2), dtype=jnp.float32)
    wg2 = jax.random.normal(keys[5], (I2, H2), dtype=jnp.float32) * (1.0 / H2 ** 0.5)
    wu2 = jax.random.normal(keys[6], (I2, H2), dtype=jnp.float32) * (1.0 / H2 ** 0.5)
    wd2 = jax.random.normal(keys[7], (H2, I2), dtype=jnp.float32) * (1.0 / I2 ** 0.5)

    out2 = jax.block_until_ready(
        mlp_pallas(x2, wg2, wu2, wd2, tile_m=16, tile_i=128))
    ref2 = mlp_reference(x2, wg2, wu2, wd2)
    assert out2.shape == (B2, S2, H2)
    assert jnp.allclose(out2, ref2, atol=1e-3, rtol=1e-3), "test-2 mismatch"

    # --- Test 3: bf16 activations/weights, f32 accumulation. ----------------
    M3, H3, I3 = 64, 128, 256
    x3 = jax.random.normal(keys[8], (M3, H3), dtype=jnp.float32)
    wg3 = jax.random.normal(keys[9], (I3, H3), dtype=jnp.float32) * (1.0 / H3 ** 0.5)
    wu3 = jax.random.normal(keys[10], (I3, H3), dtype=jnp.float32) * (1.0 / H3 ** 0.5)
    wd3 = jax.random.normal(keys[11], (H3, I3), dtype=jnp.float32) * (1.0 / I3 ** 0.5)
    x3b, wg3b, wu3b, wd3b = (a.astype(jnp.bfloat16) for a in (x3, wg3, wu3, wd3))

    out3 = jax.block_until_ready(mlp_pallas(x3b, wg3b, wu3b, wd3b))
    ref3 = mlp_reference(x3b.astype(jnp.float32), wg3b.astype(jnp.float32),
                         wu3b.astype(jnp.float32), wd3b.astype(jnp.float32))
    assert out3.shape == (M3, H3)
    assert float(jnp.max(jnp.abs(out3.astype(jnp.float32) - ref3))) < 0.1, \
        "test-3 mismatch"

    print("KERNEL_OK")
</pallas_src>

<mosaic_0001>
module attributes {stable_mosaic.version = 11 : i64} {
  func.func @_mlp_kernel(%arg0: i32, %arg1: i32, %arg2: memref<16x32xf32, #tpu.memory_space<vmem>>, %arg3: memref<128x32xf32, #tpu.memory_space<vmem>>, %arg4: memref<128x32xf32, #tpu.memory_space<vmem>>, %arg5: memref<32x128xf32, #tpu.memory_space<vmem>>, %arg6: memref<16x32xf32, #tpu.memory_space<vmem>>, %arg7: memref<16x32xf32, #tpu.memory_space<vmem>>) attributes {dimension_semantics = [#tpu.dimension_semantics<parallel>, #tpu.dimension_semantics<arbitrary>], iteration_bounds = array<i64: 1, 1>, scalar_prefetch = 0 : i64, scratch_operands = 1 : i64, tpu.core_type = #tpu.core_type<tc>, window_params = [{transform_indices = @transform_0, window_bounds = array<i64: 16, 32>}, {transform_indices = @transform_1, window_bounds = array<i64: 128, 32>}, {transform_indices = @transform_2, window_bounds = array<i64: 128, 32>}, {transform_indices = @transform_3, window_bounds = array<i64: 32, 128>}, {transform_indices = @transform_4, window_bounds = array<i64: 16, 32>}]} {
    %c0_i32 = arith.constant 0 : i32
    %0 = arith.cmpi eq, %arg1, %c0_i32 : i32
    %1 = arith.extui %0 : i1 to i32
    %c0_i32_0 = arith.constant 0 : i32
    %2 = arith.cmpi ne, %1, %c0_i32_0 : i32
    scf.if %2 {
      %cst_17 = arith.constant 0.000000e+00 : f32
      %23 = vector.broadcast %cst_17 : f32 to vector<16x32xf32>
      %c0_18 = arith.constant 0 : index
      %c0_19 = arith.constant 0 : index
      %24 = vector.load %arg7[%c0_18, %c0_19] : memref<16x32xf32, #tpu.memory_space<vmem>>, vector<16x32xf32>
      tpu.vector_store %arg7[%c0_18, %c0_19], %23 {strides = array<i32>} : memref<16x32xf32, #tpu.memory_space<vmem>>, vector<16x32xf32>,
    } else {
    }
    %c0 = arith.constant 0 : index
    %c0_1 = arith.constant 0 : index
    %3 = vector.load %arg2[%c0, %c0_1] : memref<16x32xf32, #tpu.memory_space<vmem>>, vector<16x32xf32>
    %c0_2 = arith.constant 0 : index
    %c0_3 = arith.constant 0 : index
    %4 = vector.load %arg3[%c0_2, %c0_3] : memref<128x32xf32, #tpu.memory_space<vmem>>, vector<128x32xf32>
    %cst = arith.constant dense<0.000000e+00> : vector<16x128xf32>
    %5 = tpu.matmul %3, %4, %cst {dimension_numbers = #tpu.dot_dimension_numbers<[1], [1], [0], [0], [0, 0, 1, 0], [], []>} : vector<16x32xf32>, vector<128x32xf32>, vector<16x128xf32> -> vector<16x128xf32>
    %c0_4 = arith.constant 0 : index
    %c0_5 = arith.constant 0 : index
    %6 = vector.load %arg4[%c0_4, %c0_5] : memref<128x32xf32, #tpu.memory_space<vmem>>, vector<128x32xf32>
    %cst_6 = arith.constant dense<0.000000e+00> : vector<16x128xf32>
    %7 = tpu.matmul %3, %6, %cst_6 {dimension_numbers = #tpu.dot_dimension_numbers<[1], [1], [0], [0], [0, 0, 1, 0], [], []>} : vector<16x32xf32>, vector<128x32xf32>, vector<16x128xf32> -> vector<16x128xf32>
    %8 = arith.negf %5 : vector<16x128xf32>
    %9 = math.exp %8 : vector<16x128xf32>
    %cst_7 = arith.constant 1.000000e+00 : f32
    %10 = vector.broadcast %cst_7 : f32 to vector<16x128xf32>
    %11 = arith.addf %10, %9 : vector<16x128xf32>
    %12 = arith.divf %10, %11 : vector<16x128xf32>
    %13 = arith.mulf %5, %12 : vector<16x128xf32>
    %14 = arith.mulf %13, %7 : vector<16x128xf32>
    %c0_8 = arith.constant 0 : index
    %c0_9 = arith.constant 0 : index
    %15 = vector.load %arg7[%c0_8, %c0_9] : memref<16x32xf32, #tpu.memory_space<vmem>>, vector<16x32xf32>
    %c0_10 = arith.constant 0 : index
    %c0_11 = arith.constant 0 : index
    %16 = vector.load %arg5[%c0_10, %c0_11] : memref<32x128xf32, #tpu.memory_space<vmem>>, vector<32x128xf32>
    %cst_12 = arith.constant dense<0.000000e+00> : vector<16x32xf32>
    %17 = tpu.matmul %14, %16, %cst_12 {dimension_numbers = #tpu.dot_dimension_numbers<[1], [1], [0], [0], [0, 0, 1, 0], [], []>} : vector<16x128xf32>, vector<32x128xf32>, vector<16x32xf32> -> vector<16x32xf32>
    %18 = arith.addf %15, %17 : vector<16x32xf32>
    %c0_13 = arith.constant 0 : index
    %c0_14 = arith.constant 0 : index
    %19 = vector.load %arg7[%c0_13, %c0_14] : memref<16x32xf32, #tpu.memory_space<vmem>>, vector<16x32xf32>
    tpu.vector_store %arg7[%c0_13, %c0_14], %18 {strides = array<i32>} : memref<16x32xf32, #tpu.memory_space<vmem>>, vector<16x32xf32>,
    %c0_i32_15 = arith.constant 0 : i32
    %20 = arith.cmpi eq, %arg1, %c0_i32_15 : i32
    %21 = arith.extui %20 : i1 to i32
    %c0_i32_16 = arith.constant 0 : i32
    %22 = arith.cmpi ne, %21, %c0_i32_16 : i32
    scf.if %22 {
      %c0_17 = arith.constant 0 : index
      %c0_18 = arith.constant 0 : index
      %23 = vector.load %arg7[%c0_17, %c0_18] : memref<16x32xf32, #tpu.memory_space<vmem>>, vector<16x32xf32>
      %c0_19 = arith.constant 0 : index
      %c0_20 = arith.constant 0 : index
      %24 = vector.load %arg6[%c0_19, %c0_20] : memref<16x32xf32, #tpu.memory_space<vmem>>, vector<16x32xf32>
      tpu.vector_store %arg6[%c0_19, %c0_20], %23 {strides = array<i32>} : memref<16x32xf32, #tpu.memory_space<vmem>>, vector<16x32xf32>,
    } else {
    }
    return
  }
  func.func @transform_0(%arg0: i32, %arg1: i32) -> (i32, i32) {
    %c0_i32 = arith.constant 0 : i32
    %c0_i32_0 = arith.constant 0 : i32
    return %arg0, %c0_i32 : i32, i32
  }
  func.func @transform_1(%arg0: i32, %arg1: i32) -> (i32, i32) {
    %c0_i32 = arith.constant 0 : i32
    %c0_i32_0 = arith.constant 0 : i32
    return %arg1, %c0_i32 : i32, i32
  }
  func.func @transform_2(%arg0: i32, %arg1: i32) -> (i32, i32) {
    %c0_i32 = arith.constant 0 : i32
    %c0_i32_0 = arith.constant 0 : i32
    return %arg1, %c0_i32 : i32, i32
  }
  func.func @transform_3(%arg0: i32, %arg1: i32) -> (i32, i32) {
    %c0_i32 = arith.constant 0 : i32
    %c0_i32_0 = arith.constant 0 : i32
    return %c0_i32, %arg1 : i32, i32
  }
  func.func @transform_4(%arg0: i32, %arg1: i32) -> (i32, i32) {
    %c0_i32 = arith.constant 0 : i32
    %c0_i32_0 = arith.constant 0 : i32
    return %arg0, %c0_i32 : i32, i32
  }
}

</mosaic_0001>

<bundles_post_ra>
// kernel: tpu_custom_call.1
= control target key start
LH: loop header
LB: loop body
LE: loop exit
PB: predicated region body
PF: predicated region fallthrough
CT: control target
= control target key end

     0   :  { %vm22_vm0 = vcmask 261120   ;;  %s851_s0 = inlined_call_operand.vmem [shape: f32[16,32], index: 0, kind: input, shape index: {}]   ;;  %s852_s1 = inlined_call_operand.vmem [shape: f32[128,32], index: 1, kind: input, shape index: {}]   ;;  %s853_s2 = inlined_call_operand.vmem [shape: f32[128,32], index: 2, kind: input, shape index: {}]   ;;  %s854_s3 = inlined_call_operand.vmem [shape: f32[32,128], index: 3, kind: input, shape index: {}]   ;;  %s855_s4 = inlined_call_operand.hbm [shape: f32[16,32], index: 4, kind: output, shape index: {}]  }
   0x1   :  { %v42_v0 = vld [vmem:[%s852_s1 + $0x78] sm:$0xff]  ;;  %v41_v1 = vld [vmem:[%s852_s1 + $0x70] sm:$0xff]  ;;  %v40_v4 = vld [vmem:[%s852_s1 + $0x68] sm:$0xff] }
   0x2   :  { %516 = vmatprep.subr.msk.mxu0 %vm22_vm0, %v42_v0  ;;  %v188_v2 = vld [vmem:[%s853_s2 + $0x78] sm:$0xff]  ;;  %v187_v3 = vld [vmem:[%s853_s2 + $0x70] sm:$0xff]  ;;  %v186_v5 = vld [vmem:[%s853_s2 + $0x68] sm:$0xff] }
   0x3   :  { %517 = vmatpush3.xpose.msk.msra.mxu0 %vm22_vm0, %v42_v0  ;;  %551 = vmatprep.subr.msk.mxu1 %vm22_vm0, %v188_v2  ;;  %v39_v6 = vld [vmem:[%s852_s1 + $0x60] sm:$0xff] }
   0x4   :  { %518 = vmatprep.subr.msk.mxu0 %vm22_vm0, %v41_v1  ;;  %552 = vmatpush3.xpose.msk.msra.mxu1 %vm22_vm0, %v188_v2  ;;  %v25_v7 = vld [vmem:[%s851_s0] sm:$0xff] }
   0x5   :  { %553 = vmatprep.subr.msk.mxu1 %vm22_vm0, %v187_v3  ;;  %548 = vmatprep.mubr.msk.f32.mxu0 %vm22_vm0, %v25_v7  ;;  %v185_v8 = vld [vmem:[%s853_s2 + $0x60] sm:$0xff] }
   0x6   :  { %583 = vmatprep.mubr.msk.f32.mxu1 %vm22_vm0, %v25_v7 }
   0x7   :  { %519 = vmatpush3.xpose.msk.msra.mxu0 %vm22_vm0, %v41_v1 }
   0x8   :  { %520 = vmatprep.subr.msk.mxu0 %vm22_vm0, %v40_v4  ;;  %554 = vmatpush3.xpose.msk.msra.mxu1 %vm22_vm0, %v187_v3 }
   0x9   :  { %555 = vmatprep.subr.msk.mxu1 %vm22_vm0, %v186_v5 }
   0xb   :  { %521 = vmatpush3.xpose.msk.msra.mxu0 %vm22_vm0, %v40_v4 }
   0xc   :  { %522 = vmatprep.subr.msk.mxu0 %vm22_vm0, %v39_v6 }
   0xd   :  { %9 = vsyncpa [#allocation4], 0  ;;  %v38_v9 = vld [vmem:[%s852_s1 + $0x58] sm:$0xff]  ;;  %556 = vmatpush3.xpose.msk.msra.mxu1 %vm22_vm0, %v186_v5  ;;  %v37_v11 = vld [vmem:[%s852_s1 + $0x50] sm:$0xff]  ;;  %v631_v38 = vmov 0.0  }
   0xe   :  { %557 = vmatprep.subr.msk.mxu1 %vm22_vm0, %v185_v8  ;;  %v184_v10 = vld [vmem:[%s853_s2 + $0x58] sm:$0xff]  ;;  %v183_v12 = vld [vmem:[%s853_s2 + $0x50] sm:$0xff]  ;;  %v36_v13 = vld [vmem:[%s852_s1 + $0x48] sm:$0xff]  ;;  %24 = vst.msk [vmem:[#allocation2 + $0x8] sm:$0xff] %vm22_vm0, %v631_v38 }
   0xf   :  { %523 = vmatpush3.xpose.msk.msra.mxu0 %vm22_vm0, %v39_v6  ;;  %v182_v14 = vld [vmem:[%s853_s2 + $0x48] sm:$0xff]  ;;  %v35_v15 = vld [vmem:[%s852_s1 + $0x40] sm:$0xff]  ;;  %v34_v17 = vld [vmem:[%s852_s1 + $0x38] sm:$0xff]  ;;  %23 = vst.msk [vmem:[#allocation2] sm:$0xff] %vm22_vm0, %v631_v38 }
  0x10   :  { %524 = vmatprep.subr.msk.mxu0 %vm22_vm0, %v38_v9  ;;  %v181_v16 = vld [vmem:[%s853_s2 + $0x40] sm:$0xff]  ;;  %v180_v18 = vld [vmem:[%s853_s2 + $0x38] sm:$0xff]  ;;  %v33_v19 = vld [vmem:[%s852_s1 + $0x30] sm:$0xff] }
  0x11   :  { %558 = vmatpush3.xpose.msk.msra.mxu1 %vm22_vm0, %v185_v8  ;;  %v179_v20 = vld [vmem:[%s853_s2 + $0x30] sm:$0xff]  ;;  %v32_v21 = vld [vmem:[%s852_s1 + $0x28] sm:$0xff]  ;;  %v31_v23 = vld [vmem:[%s852_s1 + $0x20] sm:$0xff] }
  0x12   :  { %559 = vmatprep.subr.msk.mxu1 %vm22_vm0, %v184_v10  ;;  %v178_v22 = vld [vmem:[%s853_s2 + $0x28] sm:$0xff]  ;;  %v177_v24 = vld [vmem:[%s853_s2 + $0x20] sm:$0xff]  ;;  %v30_v25 = vld [vmem:[%s852_s1 + $0x18] sm:$0xff] }
  0x13   :  { %525 = vmatpush3.xpose.msk.msra.mxu0 %vm22_vm0, %v38_v9  ;;  %v176_v26 = vld [vmem:[%s853_s2 + $0x18] sm:$0xff]  ;;  %v29_v27 = vld [vmem:[%s852_s1 + $0x10] sm:$0xff]  ;;  %v28_v29 = vld [vmem:[%s852_s1 + $0x8] sm:$0xff] }
  0x14   :  { %526 = vmatprep.subr.msk.mxu0 %vm22_vm0, %v37_v11  ;;  %v175_v28 = vld [vmem:[%s853_s2 + $0x10] sm:$0xff]  ;;  %v174_v30 = vld [vmem:[%s853_s2 + $0x8] sm:$0xff]  ;;  %v27_v31 = vld [vmem:[%s852_s1] sm:$0xff] }
  0x15   :  { %560 = vmatpush3.xpose.msk.msra.mxu1 %vm22_vm0, %v184_v10  ;;  %v173_v32 = vld [vmem:[%s853_s2] sm:$0xff]  ;;  %v26_v33 = vld [vmem:[%s851_s0 + $0x8] sm:$0xff]  ;;  %v333_v34 = vld [vmem:[%s854_s3 + $0x18] sm:$0xff] }
  0x16   :  { %561 = vmatprep.subr.msk.mxu1 %vm22_vm0, %v183_v12  ;;  %v332_v35 = vld [vmem:[%s854_s3 + $0x10] sm:$0xff]  ;;  %v331_v36 = vld [vmem:[%s854_s3 + $0x8] sm:$0xff]  ;;  %v330_v37 = vld [vmem:[%s854_s3] sm:$0xff]  ;;  %s632_s3 = smov [#allocation3]  }
  0x17   :  { %527 = vmatpush3.xpose.msk.msra.mxu0 %vm22_vm0, %v37_v11  ;;  %v329_v55 = vld [vmem:[#allocation2 + $0x8] sm:$0xff]  ;;  %v328_v57 = vld [vmem:[#allocation2] sm:$0xff]  ;;  %s425_s10 = sshll.u32 %s632_s3, 4  ;;  %s426_s10 = int_to_ptr.vmem [resolvable:$true] %s425_s10 }
  0x18   :  { %528 = vmatprep.subr.msk.mxu0 %vm22_vm0, %v36_v13  ;;  %s609_s11 = scalar_lea.vmem %s426_s10, 256  ;;  %p614_p1 = scmp.lt.s32.totalorder %s426_s10, %s426_s10 }
  0x19   :  { %562 = vmatpush3.xpose.msk.msra.mxu1 %vm22_vm0, %v183_v12  ;;  %p610_p0 = scmp.ne.s32.totalorder %s426_s10, %s609_s11  ;;  %p615_p2 = scmp.lt.s32.totalorder %s609_s11, %s609_s11 }
  0x1a   :  { %563 = vmatprep.subr.msk.mxu1 %vm22_vm0, %v182_v14 }
  0x1b   :  { %529 = vmatpush3.xpose.msk.msra.mxu0 %vm22_vm0, %v36_v13  ;;  %p616_p3 = por %p615_p2, %p614_p1 }
  0x1c   :  { %530 = vmatprep.subr.msk.mxu0 %vm22_vm0, %v35_v15 }
  0x1d   :  { %564 = vmatpush3.xpose.msk.msra.mxu1 %vm22_vm0, %v182_v14  ;;  %p617_p4 = pnand %p616_p3, %p610_p0 }
  0x1e   :  { %565 = vmatprep.subr.msk.mxu1 %vm22_vm0, %v181_v16 }
  0x1f   :  { %531 = vmatpush3.xpose.msk.msra.mxu0 %vm22_vm0, %v35_v15 }
  0x20   :  { %532 = vmatprep.subr.msk.mxu0 %vm22_vm0, %v34_v17 }
  0x21   :  { %566 = vmatpush3.xpose.msk.msra.mxu1 %vm22_vm0, %v181_v16 }
  0x22   :  { %567 = vmatprep.subr.msk.mxu1 %vm22_vm0, %v180_v18 }
  0x23   :  { %533 = vmatpush3.xpose.msk.msra.mxu0 %vm22_vm0, %v34_v17 }
  0x24   :  { %534 = vmatprep.subr.msk.mxu0 %vm22_vm0, %v33_v19 }
  0x25   :  { %568 = vmatpush3.xpose.msk.msra.mxu1 %vm22_vm0, %v180_v18 }
  0x26   :  { %569 = vmatprep.subr.msk.mxu1 %vm22_vm0, %v179_v20 }
  0x27   :  { %535 = vmatpush3.xpose.msk.msra.mxu0 %vm22_vm0, %v33_v19 }
  0x28   :  { %536 = vmatprep.subr.msk.mxu0 %vm22_vm0, %v32_v21 }
  0x29   :  { %570 = vmatpush3.xpose.msk.msra.mxu1 %vm22_vm0, %v179_v20 }
  0x2a   :  { %571 = vmatprep.subr.msk.mxu1 %vm22_vm0, %v178_v22 }
  0x2b   :  { %537 = vmatpush3.xpose.msk.msra.mxu0 %vm22_vm0, %v32_v21 }
  0x2c   :  { %538 = vmatprep.subr.msk.mxu0 %vm22_vm0, %v31_v23 }
  0x2d   :  { %572 = vmatpush3.xpose.msk.msra.mxu1 %vm22_vm0, %v178_v22 }
  0x2e   :  { %573 = vmatprep.subr.msk.mxu1 %vm22_vm0, %v177_v24 }
  0x2f   :  { %539 = vmatpush3.xpose.msk.msra.mxu0 %vm22_vm0, %v31_v23 }
  0x30   :  { %540 = vmatprep.subr.msk.mxu0 %vm22_vm0, %v30_v25 }
  0x31   :  { %574 = vmatpush3.xpose.msk.msra.mxu1 %vm22_vm0, %v177_v24 }
  0x32   :  { %575 = vmatprep.subr.msk.mxu1 %vm22_vm0, %v176_v26 }
  0x33   :  { %541 = vmatpush3.xpose.msk.msra.mxu0 %vm22_vm0, %v30_v25 }
  0x34   :  { %542 = vmatprep.subr.msk.mxu0 %vm22_vm0, %v29_v27 }
  0x35   :  { %576 = vmatpush3.xpose.msk.msra.mxu1 %vm22_vm0, %v176_v26 }
  0x36   :  { %577 = vmatprep.subr.msk.mxu1 %vm22_vm0, %v175_v28 }
  0x37   :  { %543 = vmatpush3.xpose.msk.msra.mxu0 %vm22_vm0, %v29_v27 }
  0x38   :  { %544 = vmatprep.subr.msk.mxu0 %vm22_vm0, %v28_v29 }
  0x39   :  { %578 = vmatpush3.xpose.msk.msra.mxu1 %vm22_vm0, %v175_v28 }
  0x3a   :  { %579 = vmatprep.subr.msk.mxu1 %vm22_vm0, %v174_v30 }
  0x3b   :  { %545 = vmatpush3.xpose.msk.msra.mxu0 %vm22_vm0, %v28_v29 }
  0x3c   :  { %546 = vmatprep.subr.msk.mxu0 %vm22_vm0, %v27_v31 }
  0x3d   :  { %580 = vmatpush3.xpose.msk.msra.mxu1 %vm22_vm0, %v174_v30 }
  0x3e   :  { %581 = vmatprep.subr.msk.mxu1 %vm22_vm0, %v173_v32 }
  0x3f   :  { %547 = vmatpush3.xpose.msk.msra.mxu0 %vm22_vm0, %v27_v31 }
  0x40   :  { %586 = vmatprep.subr.mxu0 %v333_v34 }
  0x41   :  { %582 = vmatpush3.xpose.msk.msra.mxu1 %vm22_vm0, %v173_v32 }
  0x42   :  { %549 = vmatmul.mubr.msk.f32.vlgmr.msra.gmra.mxu0 %vm22_vm0, %v26_v33 }
  0x43   :  { %587 = vmatpush3.xpose.msra.mxu0 %v333_v34 }
  0x44   :  { %584 = vmatmul.mubr.msk.f32.vlgmr.msra.gmra.mxu1 %vm22_vm0, %v26_v33  ;;  %588 = vmatprep.subr.mxu0 %v332_v35 }
  0x47   :  { %589 = vmatpush3.xpose.msra.mxu0 %v332_v35 }
  0x48   :  { %590 = vmatprep.subr.mxu0 %v331_v36 }
  0x4b   :  { %591 = vmatpush3.xpose.msra.mxu0 %v331_v36 }
  0x4c   :  { %592 = vmatprep.subr.mxu0 %v330_v37 }
  0x4f   :  { %593 = vmatpush3.xpose.msra.mxu0 %v330_v37 }
 0x102   :  { %v550_v39 = vpop.f32.mrf.mxu0 }
 0x103   :  { %v473_v40 = vmul.f32 -1.442695, %v550_v39 }
 0x104   :  { %v164_v41 = vpop.f32.mrf.mxu0  ;;  %v585_v48 = vpop.f32.mrf.mxu1 }
 0x105   :  { %601 = vpow2.f32 %v473_v40  ;;  %v472_v42 = vmul.f32 -1.442695, %v164_v41 }
 0x106   :  { %v303_v52 = vpop.f32.mrf.mxu1 }
 0x107   :  { %603 = vpow2.f32 %v472_v42 }
 0x112   :  { %v602_v43 = vpop.eup %601 }
 0x113   :  { %v319_v44 = vadd.f32 1.0, %v602_v43 }
 0x114   :  { %v604_v45 = vpop.eup %603 }
 0x115   :  { %605 = vrcp.f32 %v319_v44  ;;  %v318_v46 = vadd.f32 1.0, %v604_v45 }
 0x117   :  { %607 = vrcp.f32 %v318_v46 }
 0x122   :  { %v606_v47 = vpop.eup %605 }
 0x123   :  { %v325_v50 = vmul.f32 %v606_v47, %v550_v39 }
 0x124   :  { %v608_v49 = vpop.eup %607 }
 0x125   :  { %v324_v51 = vmul.f32 %v608_v49, %v164_v41  ;;  %v327_v54 = vmul.f32 %v585_v48, %v325_v50 }
 0x127   :  { %v326_v53 = vmul.f32 %v324_v51, %v303_v52 }
 0x129   :  { %594 = vmatprep.mubr.f32.mxu0 %v326_v53 }
 0x12a   :  { %595 = vmatmul.mubr.f32.vlgmr.msra.gmra.mxu0 %v327_v54 }
 0x1ea   :  { %v596_v56 = vpop.f32.mrf.mxu0 }
 0x1eb   :  { %v410_v58 = vadd.f32 %v596_v56, %v329_v55 }
 0x1ec   :  { %v400_v59 = vpop.f32.mrf.mxu0 }
 0x1ed   :  { %412 = vst.msk [vmem:[#allocation2 + $0x8] sm:$0xff] %vm22_vm0, %v410_v58  ;;  %v409_v60 = vadd.f32 %v400_v59, %v328_v57 }
 0x1ef   :  { %411 = vst.msk [vmem:[#allocation2] sm:$0xff] %vm22_vm0, %v409_v60 }
 0x1f4   :  { %v417_v61 = vld [vmem:[#allocation2 + $0x8] sm:$0xff] }
 0x1f5   :  { %419 = vst.msk [vmem:[#allocation3 + $0x8] sm:$0xff] %vm22_vm0, %v417_v61 }
 0x1f6   :  { %v416_v62 = vld [vmem:[#allocation2] sm:$0xff] }
 0x1f7   :  { %418 = vst.msk [vmem:[#allocation3] sm:$0xff] %vm22_vm0, %v416_v62 }
 0x1f8   :  { %620 = shalt.err (!%p617_p4)
}
 0x1f9   :  { %s633_s12 = smov 128   ;;  %s634_s13 = smov 8  }
 0x1fa   :  { %431 = dma.vmem_to_hbm [thread:$0]  %s426_s10, 256, %s855_s4, [#allocation4], %s633_s12, %s633_s12, %s634_s13  }
 0x1fb   :  { %629 = dma.done.wait [#allocation4], 256  }
 0x1fc   :  { %630 = vsyncadd [#allocation4], 4294967040 }
 0x1fd   :  { %435 = vsyncpa [#allocation4], 1 }

</bundles_post_ra>
